<compile_context>
chip_gen: v5e
topology: v5e:2x2
jax: 0.10.0
libtpu: 0.0.40
codegen_flags: <defaults>
</compile_context>

<pallas_src>
import functools

import numpy as np
import jax
import jax.numpy as jnp
from jax.experimental import pallas as pl
from jax.experimental.pallas import tpu as pltpu


_VMEM = pl.BlockSpec(memory_space=pltpu.MemorySpace.VMEM)


# ----------------------------------------------------------------------------
# Hoisted per-layer projection: h = x @ W and fused attention scalars
# ----------------------------------------------------------------------------
def project_kernel(x_ref, w_ref, sel_ref, h_ref, a_ref):
    # bf16 inputs, f32 accumulation on the MXU.
    h = jnp.dot(x_ref[...], w_ref[...], preferred_element_type=jnp.float32)    # [N, HC]
    # Fused att_src|att_dst selector matmul: one [N, 2H] result instead of two.
    a_ref[...] = jnp.dot(h, sel_ref[...], preferred_element_type=jnp.float32)  # [N, 2H]
    # Resident projected features stay bf16 only (halves the largest VMEM tensor).
    h_ref[...] = h.astype(jnp.bfloat16)


def _head_select_matrix(att, heads, out_per_head):
    # M [H*C, H] with M[h*C + c, h] = att[h, c] so (h_flat @ M)[n, h] = <h[n,h,:], att[h,:]>.
    eye = jnp.eye(heads, dtype=jnp.float32)
    return (att[:, :, None] * eye[:, None, :]).reshape(heads * out_per_head, heads)


# ----------------------------------------------------------------------------
# Fused attention + aggregation kernel (one dst-node tile per grid step)
# ----------------------------------------------------------------------------
def gat_conv_kernel(h_ref, asrc_ref, adst_ref, adj_ref, bias_ref, out_ref, *,
                    heads, out_per_head, apply_elu, neg_slope=0.2):
    C = out_per_head
    hv = h_ref[...]                                   # [N, H*C] bf16 (resident, all sources)
    edge_mask = adj_ref[...] > 0                      # [T, N]

    if heads == 1:
        # Single-head layer: stays 2-D and lane-dense end to end.
        e = adst_ref[...] + asrc_ref[...]             # [T, 1] + [1, N] -> [T, N]
        e = jnp.where(e >= 0.0, e, neg_slope * e)     # LeakyReLU(0.2)
        e = jnp.where(edge_mask, e, -1e30)            # mask non-edges
        m = jnp.max(e, axis=-1, keepdims=True)
        p = jnp.exp(e - m)                            # exp(-1e30 - m) underflows to 0
        denom = jnp.sum(p, axis=-1, keepdims=True)
        alpha = p * pl.reciprocal(denom, approx=False)
        out = jnp.dot(alpha.astype(jnp.bfloat16), hv,
                      preferred_element_type=jnp.float32)                      # [T, C]
    else:
        # Attention logits for every head at once: e[h, i, j] for edge j -> i.
        a_dst_t = adst_ref[...].T                     # [T, H] -> [H, T] (one tiny XLU transpose)
        e = a_dst_t[:, :, None] + asrc_ref[...][:, None, :]                    # [H, T, N]
        e = jnp.where(e >= 0.0, e, neg_slope * e)                              # LeakyReLU(0.2)
        e = jnp.where(edge_mask[None, :, :], e, -1e30)
        m = jnp.max(e, axis=-1, keepdims=True)
        # TODO(synk): cast (e - m) to bf16 before exp on v6e/v7x (~2x EUP); kept f32 for v5e parity.
        p = jnp.exp(e - m)
        denom = jnp.sum(p, axis=-1, keepdims=True)
        alpha = (p * pl.reciprocal(denom, approx=False)).astype(jnp.bfloat16)  # [H, T, N]
        # Per-head aggregation, lane-concatenated into one lane-dense [T, H*C] slab -> ONE store.
        # TODO(synk): fold into a single lax.dot_general batched over heads to fill MXU output width.
        pieces = [jnp.dot(alpha[h], hv[:, h * C:(h + 1) * C],
                          preferred_element_type=jnp.float32)
                  for h in range(heads)]
        out = jnp.concatenate(pieces, axis=-1)                                 # [T, H*C]

    out = out + bias_ref[...]
    if apply_elu:
        out = jnp.where(out > 0.0, out, jnp.exp(jnp.minimum(out, 0.0)) - 1.0)  # ELU
    out_ref[...] = out.astype(out_ref.dtype)


def gat_conv(x, adj_bf16, params, *, heads, out_per_head, apply_elu, out_dtype,
             tile_dst=None):
    N, _ = x.shape
    HC = heads * out_per_head

    # --- 1) hoisted projection + fused attention scalars (single call, whole graph) ---
    sel = jnp.concatenate(
        [_head_select_matrix(params["att_src"], heads, out_per_head),
         _head_select_matrix(params["att_dst"], heads, out_per_head)], axis=1)  # [HC, 2H]
    h_flat, a_all = pl.pallas_call(
        project_kernel,
        out_shape=(jax.ShapeDtypeStruct((N, HC), jnp.bfloat16),
                   jax.ShapeDtypeStruct((N, 2 * heads), jnp.float32)),
        in_specs=[_VMEM, _VMEM, _VMEM],
        out_specs=(_VMEM, _VMEM),
    )(x.astype(jnp.bfloat16), params["W"].astype(jnp.bfloat16), sel)

    # Tiny per-layer XLA layout glue (no per-tile recompute).
    a_src_t = a_all[:, :heads].T          # [H, N]
    a_dst = a_all[:, heads:]              # [N, H]

    # --- 2) per-dst-tile attention + aggregation ---
    if tile_dst is None:
        tile_dst = min(128, N)
        if N // tile_dst < 2 and N % 16 == 0:   # keep >=2 grid steps for v7x's 2 TensorCores
            tile_dst = N // 2
    assert N % tile_dst == 0 and tile_dst % 8 == 0

    kernel = functools.partial(gat_conv_kernel, heads=heads,
                               out_per_head=out_per_head, apply_elu=apply_elu)
    # TODO(synk): for large N, pad the source axis to a multiple of 128 and switch to an
    # online-softmax over source blocks so the [H, T, N] logits never exceed VMEM.
    return pl.pallas_call(
        kernel,
        out_shape=jax.ShapeDtypeStruct((N, HC), out_dtype),
        grid=(N // tile_dst,),
        in_specs=[
            pl.BlockSpec((N, HC), lambda i: (0, 0)),            # h (all sources, bf16, resident)
            pl.BlockSpec((heads, N), lambda i: (0, 0)),         # a_src^T (resident)
            pl.BlockSpec((tile_dst, heads), lambda i: (i, 0)),  # a_dst (dst tile)
            pl.BlockSpec((tile_dst, N), lambda i: (i, 0)),      # adj dst-row tile
            pl.BlockSpec((1, HC), lambda i: (0, 0)),            # bias
        ],
        out_specs=pl.BlockSpec((tile_dst, HC), lambda i: (i, 0)),
        compiler_params=pltpu.CompilerParams(
            dimension_semantics=("parallel",),
            vmem_limit_bytes=48 * 1024 * 1024),  # stays within v7x's 64 MiB physical VMEM
    )(h_flat, a_src_t, a_dst, adj_bf16, params["bias"].reshape(1, HC))


# ----------------------------------------------------------------------------
# Fused global-mean-pool + classifier MLP kernel
# ----------------------------------------------------------------------------
def pool_mlp_kernel(x_ref, seg_ref, invc_ref, w1_ref, b1_ref, w2_ref, b2_ref, out_ref):
    # global mean pool in f32 (parity with torch global_mean_pool), scaled by 1/count
    pooled = jnp.dot(seg_ref[...], x_ref[...],
                     preferred_element_type=jnp.float32) * invc_ref[...]       # [G, D]
    h = jnp.dot(pooled, w1_ref[...], preferred_element_type=jnp.float32) + b1_ref[...]
    h = jnp.maximum(h, 0.0)                                                    # ReLU
    # dropout is eval-mode identity
    out_ref[...] = jnp.dot(h, w2_ref[...],
                           preferred_element_type=jnp.float32) + b2_ref[...]


def pool_and_classify(x, seg_f32, counts, params):
    G = seg_f32.shape[0]
    out_dim = params["W2"].shape[1]
    inv_counts = (1.0 / counts).reshape(G, 1).astype(jnp.float32)
    return pl.pallas_call(
        pool_mlp_kernel,
        out_shape=jax.ShapeDtypeStruct((G, out_dim), jnp.float32),
        in_specs=[_VMEM] * 7,
        out_specs=_VMEM,
    )(x, seg_f32, inv_counts,
      params["W1"], params["b1"].reshape(1, -1),
      params["W2"], params["b2"].reshape(1, -1))


# ----------------------------------------------------------------------------
# Full GAT forward
# ----------------------------------------------------------------------------
def gat_forward(x, adj_bf16, seg_f32, counts, conv_params, clf_params):
    n_layers = len(conv_params)
    for i, p in enumerate(conv_params):
        last = i == n_layers - 1
        x = gat_conv(x, adj_bf16, p, heads=p["heads"], out_per_head=p["out_per_head"],
                     apply_elu=not last,                       # F.elu after every conv except last
                     out_dtype=jnp.float32 if last else jnp.bfloat16)
    return pool_and_classify(x, seg_f32, counts, clf_params)


# ----------------------------------------------------------------------------
# Deterministic parameter / input construction
# ----------------------------------------------------------------------------
def make_gatconv_params(key, in_dim, out_per_head, heads):
    k1, k2, k3 = jax.random.split(key, 3)
    return {
        "W": jax.random.normal(k1, (in_dim, heads * out_per_head), jnp.float32) * 0.1,
        "att_src": jax.random.normal(k2, (heads, out_per_head), jnp.float32) * 0.1,
        "att_dst": jax.random.normal(k3, (heads, out_per_head), jnp.float32) * 0.1,
        "bias": jnp.zeros((heads * out_per_head,), jnp.float32),
        "heads": heads,
        "out_per_head": out_per_head,
    }


if __name__ == "__main__":
    key = jax.random.PRNGKey(0)

    # GAT(node_features=16, hidden_dim=128, num_layers=3, num_heads=8, output_dim=1)
    node_features = 16
    hidden_dim = 128          # H*C = 128 -> lane-dense layer outputs
    num_layers = 3
    num_heads = 8
    output_dim = 1

    nodes_per_graph = 16
    num_graphs = 4
    N = nodes_per_graph * num_graphs          # 64 nodes -> 2 dst tiles of 32

    # --- node features ---
    key, kx = jax.random.split(key)
    x = jax.random.normal(kx, (N, node_features), jnp.float32)

    # --- graph structure: ring graphs (bidirectional edges) + self loops ---
    adj_np = np.zeros((N, N), np.float32)
    for g in range(num_graphs):
        off = g * nodes_per_graph
        for i in range(nodes_per_graph):
            src = off + i
            dst = off + (i + 1) % nodes_per_graph
            adj_np[dst, src] = 1.0             # edge src -> dst
            adj_np[src, dst] = 1.0             # edge dst -> src
    adj_np = np.minimum(adj_np + np.eye(N, dtype=np.float32), 1.0)  # add_self_loops
    adj = jnp.asarray(adj_np, dtype=jnp.bfloat16)                   # compact 0/1 structure

    # --- batch assignment / pooling matrix (f32 for mean-pool parity) ---
    batch = np.repeat(np.arange(num_graphs), nodes_per_graph)
    seg_np = (batch[None, :] == np.arange(num_graphs)[:, None]).astype(np.float32)
    seg = jnp.asarray(seg_np, dtype=jnp.float32)                    # [G, N]
    counts = jnp.full((num_graphs,), float(nodes_per_graph), jnp.float32)

    # --- conv stack parameters ---
    conv_params = []
    key, k0 = jax.random.split(key)
    conv_params.append(make_gatconv_params(k0, node_features,
                                           hidden_dim // num_heads, num_heads))
    for _ in range(num_layers - 2):
        key, km = jax.random.split(key)
        conv_params.append(make_gatconv_params(km, hidden_dim,
                                               hidden_dim // num_heads, num_heads))
    key, kl = jax.random.split(key)
    conv_params.append(make_gatconv_params(kl, hidden_dim, hidden_dim, 1))

    # --- classifier parameters: Linear(128,64) -> ReLU -> Dropout -> Linear(64,1) ---
    key, kc1, kc2 = jax.random.split(key, 3)
    clf_params = {
        "W1": jax.random.normal(kc1, (hidden_dim, hidden_dim // 2), jnp.float32) * 0.1,
        "b1": jnp.zeros((hidden_dim // 2,), jnp.float32),
        "W2": jax.random.normal(kc2, (hidden_dim // 2, output_dim), jnp.float32) * 0.1,
        "b2": jnp.zeros((output_dim,), jnp.float32),
    }

    # TODO(synk): dropout (feature + attention-coefficient) is eval-mode identity here.
    out = gat_forward(x, adj, seg, counts, conv_params, clf_params)
    jax.block_until_ready(out)
    assert out.shape == (num_graphs, output_dim)
    print("KERNEL_OK")
</pallas_src>

<mosaic_0001>
module attributes {stable_mosaic.version = 11 : i64} {
  func.func @project_kernel(%arg0: memref<64x16xbf16, #tpu.memory_space<vmem>>, %arg1: memref<16x128xbf16, #tpu.memory_space<vmem>>, %arg2: memref<128x16xf32, #tpu.memory_space<vmem>>, %arg3: memref<64x128xbf16, #tpu.memory_space<vmem>>, %arg4: memref<64x16xf32, #tpu.memory_space<vmem>>) attributes {dimension_semantics = [], scalar_prefetch = 0 : i64, scratch_operands = 0 : i64, tpu.core_type = #tpu.core_type<tc>} {
    %c0 = arith.constant 0 : index
    %c0_0 = arith.constant 0 : index
    %0 = vector.load %arg0[%c0, %c0_0] : memref<64x16xbf16, #tpu.memory_space<vmem>>, vector<64x16xbf16>
    %c0_1 = arith.constant 0 : index
    %c0_2 = arith.constant 0 : index
    %1 = vector.load %arg1[%c0_1, %c0_2] : memref<16x128xbf16, #tpu.memory_space<vmem>>, vector<16x128xbf16>
    %cst = arith.constant dense<0.000000e+00> : vector<64x128xf32>
    %2 = tpu.matmul %0, %1, %cst {dimension_numbers = #tpu.dot_dimension_numbers<[1], [0], [0], [1], [0, 0, 1, 1], [], []>} : vector<64x16xbf16>, vector<16x128xbf16>, vector<64x128xf32> -> vector<64x128xf32>
    %c0_3 = arith.constant 0 : index
    %c0_4 = arith.constant 0 : index
    %3 = vector.load %arg2[%c0_3, %c0_4] : memref<128x16xf32, #tpu.memory_space<vmem>>, vector<128x16xf32>
    %cst_5 = arith.constant dense<0.000000e+00> : vector<64x16xf32>
    %4 = tpu.matmul %2, %3, %cst_5 {dimension_numbers = #tpu.dot_dimension_numbers<[1], [0], [0], [1], [0, 0, 1, 1], [], []>} : vector<64x128xf32>, vector<128x16xf32>, vector<64x16xf32> -> vector<64x16xf32>
    %c0_6 = arith.constant 0 : index
    %c0_7 = arith.constant 0 : index
    %5 = vector.load %arg4[%c0_6, %c0_7] : memref<64x16xf32, #tpu.memory_space<vmem>>, vector<64x16xf32>
    tpu.vector_store %arg4[%c0_6, %c0_7], %4 {strides = array<i32>} : memref<64x16xf32, #tpu.memory_space<vmem>>, vector<64x16xf32>,
    %6 = arith.truncf %2 : vector<64x128xf32> to vector<64x128xbf16>
    %c0_8 = arith.constant 0 : index
    %c0_9 = arith.constant 0 : index
    %7 = vector.load %arg3[%c0_8, %c0_9] : memref<64x128xbf16, #tpu.memory_space<vmem>>, vector<64x128xbf16>
    tpu.vector_store %arg3[%c0_8, %c0_9], %6 {strides = array<i32>} : memref<64x128xbf16, #tpu.memory_space<vmem>>, vector<64x128xbf16>,
    return
  }
}

</mosaic_0001>

<bundles_post_ra>
// kernel: tpu_custom_call.1
= control target key start
LH: loop header
LB: loop body
LE: loop exit
PB: predicated region body
PF: predicated region fallthrough
CT: control target
= control target key end

     0   :  { %s443_s0 = inlined_call_operand.vmem [shape: bf16[64,16], index: 0, kind: input, shape index: {}]   ;;  %s444_s1 = inlined_call_operand.vmem [shape: bf16[16,128], index: 1, kind: input, shape index: {}]   ;;  %s445_s2 = inlined_call_operand.vmem [shape: f32[128,16], index: 2, kind: input, shape index: {}]   ;;  %s446_s3 = inlined_call_operand.hbm [shape: bf16[64,128], index: 3, kind: output, shape index: {0}]   ;;  %s447_s4 = inlined_call_operand.vmem [shape: f32[64,16], index: 4, kind: output, shape index: {1}]  }
   0x1   :  { %v227_v0 = vld [vmem:[%s444_s1] sm:$0xff]  ;;  %v224_v1 = vld [vmem:[%s443_s0 + $0x8] sm:$0xff] }
   0x2   :  { %10 = vsyncpa [#allocation3], 0  ;;  %251 = vmatpush.bf16.msra.mxu2 %v227_v0  ;;  %vm54_vm0 = vcmask 130048   ;;  %74 = vmatpush.bf16.msra.mxu0 %v227_v0  ;;  %v223_v2 = vld [vmem:[%s443_s0] sm:$0xff]  ;;  %v111_v3 = vld [vmem:[%s445_s2 + $0x78] sm:$0xff]  ;;  %s183_s5 = sshll.u32 %s446_s3, 4  ;;  %s184_s5 = int_to_ptr.hbm [resolvable:$true] %s183_s5 }
   0x3   :  { %v110_v4 = vld [vmem:[%s445_s2 + $0x70] sm:$0xff]  ;;  %252 = vmatpush.msra.mxu1 %v111_v3  ;;  %253 = vmatpush.msra.mxu3 %v111_v3  ;;  %v109_v5 = vld [vmem:[%s445_s2 + $0x68] sm:$0xff]  ;;  %v108_v6 = vld [vmem:[%s445_s2 + $0x60] sm:$0xff]  ;;  %s314_s6 = smov 64   ;;  %s315_s7 = smov 4  }
   0x4   :  { %v107_v7 = vld [vmem:[%s445_s2 + $0x58] sm:$0xff]  ;;  %v106_v8 = vld [vmem:[%s445_s2 + $0x50] sm:$0xff]  ;;  %v105_v9 = vld [vmem:[%s445_s2 + $0x48] sm:$0xff] }
   0x5   :  { %220 = vmatmul.msk.bf16.vlgmr.msra.gmra.mxu2 %vm54_vm0, %v224_v1  ;;  %219 = vmatmul.msk.bf16.vlgmr.msra.gmra.mxu0 %vm54_vm0, %v223_v2  ;;  %v225_v10 = vld [vmem:[%s443_s0 + $0x10] sm:$0xff]  ;;  %v104_v11 = vld [vmem:[%s445_s2 + $0x40] sm:$0xff]  ;;  %v103_v12 = vld [vmem:[%s445_s2 + $0x38] sm:$0xff] }
   0x6   :  { %254 = vmatpush.msra.mxu1 %v110_v4  ;;  %255 = vmatpush.msra.mxu3 %v110_v4  ;;  %v102_v13 = vld [vmem:[%s445_s2 + $0x30] sm:$0xff]  ;;  %v101_v14 = vld [vmem:[%s445_s2 + $0x28] sm:$0xff]  ;;  %v100_v15 = vld [vmem:[%s445_s2 + $0x20] sm:$0xff] }
   0x7   :  { %112 = vmatpush.msrb.mxu0 %v111_v3  ;;  %v99_v16 = vld [vmem:[%s445_s2 + $0x18] sm:$0xff]  ;;  %v98_v17 = vld [vmem:[%s445_s2 + $0x10] sm:$0xff]  ;;  %v97_v18 = vld [vmem:[%s445_s2 + $0x8] sm:$0xff] }
   0x8   :  { %256 = vmatpush.msra.mxu1 %v109_v5  ;;  %257 = vmatpush.msra.mxu3 %v109_v5  ;;  %v226_v19 = vld [vmem:[%s443_s0 + $0x18] sm:$0xff]  ;;  %v96_v20 = vld [vmem:[%s445_s2] sm:$0xff]  ;;  %s313_s0 = smov [#allocation2]  }
   0x9   :  { %113 = vmatpush.msrb.mxu0 %v110_v4  ;;  %s181_s2 = sshll.u32 %s313_s0, 4  ;;  %s182_s2 = int_to_ptr.vmem [resolvable:$true] %s181_s2 }
   0xa   :  { %258 = vmatpush.msra.mxu1 %v108_v6  ;;  %259 = vmatpush.msra.mxu3 %v108_v6 }
   0xb   :  { %114 = vmatpush.msrb.mxu0 %v109_v5 }
   0xc   :  { %260 = vmatpush.msra.mxu1 %v107_v7  ;;  %261 = vmatpush.msra.mxu3 %v107_v7 }
   0xd   :  { %115 = vmatpush.msrb.mxu0 %v108_v6 }
   0xe   :  { %262 = vmatpush.msra.mxu1 %v106_v8  ;;  %263 = vmatpush.msra.mxu3 %v106_v8 }
   0xf   :  { %116 = vmatpush.msrb.mxu0 %v107_v7 }
  0x10   :  { %264 = vmatpush.msra.mxu1 %v105_v9  ;;  %265 = vmatpush.msra.mxu3 %v105_v9 }
  0x11   :  { %117 = vmatpush.msrb.mxu0 %v106_v8 }
  0x12   :  { %266 = vmatpush.msra.mxu1 %v104_v11  ;;  %267 = vmatpush.msra.mxu3 %v104_v11 }
  0x13   :  { %118 = vmatpush.msrb.mxu0 %v105_v9 }
  0x14   :  { %268 = vmatpush.msra.mxu1 %v103_v12  ;;  %269 = vmatpush.msra.mxu3 %v103_v12 }
  0x15   :  { %221 = vmatmul.msk.bf16.gmra.mxu2 %vm54_vm0, %v225_v10  ;;  %119 = vmatpush.msrb.mxu0 %v104_v11 }
  0x16   :  { %270 = vmatpush.msra.mxu1 %v102_v13  ;;  %271 = vmatpush.msra.mxu3 %v102_v13 }
  0x17   :  { %120 = vmatpush.msrb.mxu0 %v103_v12 }
  0x18   :  { %272 = vmatpush.msra.mxu1 %v101_v14  ;;  %273 = vmatpush.msra.mxu3 %v101_v14 }
  0x19   :  { %121 = vmatpush.msrb.mxu0 %v102_v13 }
  0x1a   :  { %274 = vmatpush.msra.mxu1 %v100_v15  ;;  %275 = vmatpush.msra.mxu3 %v100_v15 }
  0x1b   :  { %122 = vmatpush.msrb.mxu0 %v101_v14 }
  0x1c   :  { %276 = vmatpush.msra.mxu1 %v99_v16  ;;  %277 = vmatpush.msra.mxu3 %v99_v16 }
  0x1d   :  { %123 = vmatpush.msrb.mxu0 %v100_v15 }
  0x1e   :  { %278 = vmatpush.msra.mxu1 %v98_v17  ;;  %279 = vmatpush.msra.mxu3 %v98_v17 }
  0x1f   :  { %124 = vmatpush.msrb.mxu0 %v99_v16 }
  0x20   :  { %280 = vmatpush.msra.mxu1 %v97_v18  ;;  %281 = vmatpush.msra.mxu3 %v97_v18 }
  0x21   :  { %125 = vmatpush.msrb.mxu0 %v98_v17 }
  0x22   :  { %282 = vmatpush.msra.mxu1 %v96_v20  ;;  %283 = vmatpush.msra.mxu3 %v96_v20 }
  0x23   :  { %126 = vmatpush.msrb.mxu0 %v97_v18 }
  0x25   :  { %222 = vmatmul.msk.bf16.gmra.mxu2 %vm54_vm0, %v226_v19  ;;  %127 = vmatpush.msrb.mxu0 %v96_v20 }
  0x82   :  { %v76_v21 = vpop.f32.mrf.mxu0 }
  0x83   :  { %128 = vmatmul.f32.vlgmr.msrb.gmra.mxu0 %v76_v21 }
  0x88   :  { %v81_v22 = vpop.f32.mrf.mxu2 }
  0x89   :  { %134 = vmatmul.f32.vlgmr.msra.gmra.mxu1 %v81_v22 }
  0x8a   :  { %v78_v23 = vpop.f32.mrf.mxu0 }
  0x8b   :  { %v231_v24 = vpack.c.bf16 %v78_v23, %v76_v21  ;;  %131 = vmatmul.f32.gmra.mxu0 %v78_v23 }
  0x8d   :  { %232 = vst [vmem:[#allocation2] sm:$0xff] %v231_v24  }
  0x90   :  { %v83_v25 = vpop.f32.mrf.mxu2 }
  0x91   :  { %v236_v26 = vpack.c.bf16 %v83_v25, %v81_v22  ;;  %137 = vmatmul.f32.gmra.mxu1 %v83_v25 }
  0x93   :  { %248 = vst [vmem:[#allocation2 + $0x8] sm:$0xff] %v236_v26  }
  0x98   :  { %v86_v27 = vpop.f32.mrf.mxu2 }
  0x99   :  { %140 = vmatmul.f32.gmra.mxu1 %v86_v27 }
  0xa0   :  { %v88_v28 = vpop.f32.mrf.mxu2 }
  0xa1   :  { %v241_v29 = vpack.c.bf16 %v88_v28, %v86_v27  ;;  %143 = vmatmul.f32.vlgmr.msra.gmra.mxu3 %v88_v28 }
  0xa3   :  { %249 = vst [vmem:[#allocation2 + $0x10] sm:$0xff] %v241_v29  }
  0xa8   :  { %v91_v30 = vpop.f32.mrf.mxu2 }
  0xa9   :  { %146 = vmatmul.f32.gmra.mxu3 %v91_v30 }
  0xb0   :  { %v93_v31 = vpop.f32.mrf.mxu2 }
  0xb1   :  { %v246_v32 = vpack.c.bf16 %v93_v31, %v91_v30  ;;  %149 = vmatmul.f32.gmra.mxu3 %v93_v31 }
  0xb3   :  { %250 = vst [vmem:[#allocation2 + $0x18] sm:$0xff] %v246_v32  }
  0xb4   :  { %189 = dma.vmem_to_hbm [thread:$0]  %s182_s2, 512, %s184_s5, [#allocation3], %s314_s6, %s314_s6, %s315_s7  }
 0x100   :  { %v129_v33 = vpop.f32.mrf.mxu0 }
 0x101   :  { %153 = vst.msk [vmem:[%s447_s4] sm:$0xff] %vm54_vm0, %v129_v33 }
 0x106   :  { %v135_v34 = vpop.f32.mrf.mxu1 }
 0x107   :  { %155 = vst.msk [vmem:[%s447_s4 + $0x10] sm:$0xff] %vm54_vm0, %v135_v34 }
 0x108   :  { %v132_v35 = vpop.f32.mrf.mxu0 }
 0x109   :  { %154 = vst.msk [vmem:[%s447_s4 + $0x8] sm:$0xff] %vm54_vm0, %v132_v35 }
 0x10e   :  { %v138_v36 = vpop.f32.mrf.mxu1 }
 0x10f   :  { %156 = vst.msk [vmem:[%s447_s4 + $0x18] sm:$0xff] %vm54_vm0, %v138_v36 }
 0x116   :  { %v141_v37 = vpop.f32.mrf.mxu1 }
 0x117   :  { %157 = vst.msk [vmem:[%s447_s4 + $0x20] sm:$0xff] %vm54_vm0, %v141_v37 }
 0x124   :  { %v144_v38 = vpop.f32.mrf.mxu3 }
 0x125   :  { %158 = vst.msk [vmem:[%s447_s4 + $0x28] sm:$0xff] %vm54_vm0, %v144_v38 }
 0x12c   :  { %v147_v39 = vpop.f32.mrf.mxu3 }
 0x12d   :  { %159 = vst.msk [vmem:[%s447_s4 + $0x30] sm:$0xff] %vm54_vm0, %v147_v39 }
 0x134   :  { %v150_v40 = vpop.f32.mrf.mxu3 }
 0x135   :  { %160 = vst.msk [vmem:[%s447_s4 + $0x38] sm:$0xff] %vm54_vm0, %v150_v40 }
 0x136   :  { %311 = dma.done.wait [#allocation3], 512  }
 0x137   :  { %312 = vsyncadd [#allocation3], 4294966784 }
 0x138   :  { %198 = vsyncpa [#allocation3], 1 }

</bundles_post_ra>
